<compile_context>
chip_gen: v7x
topology: tpu7x:2x2x1
jax: 0.10.0
libtpu: 0.0.40
codegen_flags: <defaults>
</compile_context>

<pallas_src>
import math

import jax
import jax.numpy as jnp
from jax.experimental import pallas as pl
from jax.experimental.pallas import tpu as pltpu

# Make the pure-JAX reference (and the in-kernel f32 dots) full-precision so
# the correctness checks are not at the mercy of the default matmul precision.
jax.config.update("jax_default_matmul_precision", "highest")


def _round_up(x: int, m: int) -> int:
    return ((x + m - 1) // m) * m


# ---------------------------------------------------------------------------
# Kernel: one (batch-tile i, hidden-chunk k) step of  tanh(x @ W1 + b1) @ W2 + b2
# The output block index (i, 0) is constant across k, so the block stays
# resident in VMEM for the whole hidden loop and doubles as the accumulator.
# ---------------------------------------------------------------------------
def _mlp_kernel(x_ref, w1_ref, b1_ref, w2_ref, b2_ref, o_ref):
    k = pl.program_id(1)

    @pl.when(k == 0)
    def _init():
        o_ref[...] = jnp.zeros_like(o_ref)

    # Layer 1 on this hidden chunk: f32 MXU accumulation, f32 bias + tanh (EUP).
    h = jnp.tanh(
        jnp.dot(x_ref[...], w1_ref[...], preferred_element_type=jnp.float32)
        + b1_ref[...]
    )
    # Layer 2 contribution of this hidden chunk, accumulated into o_ref (f32).
    o_ref[...] += jnp.dot(
        h.astype(w2_ref.dtype), w2_ref[...], preferred_element_type=jnp.float32
    )

    @pl.when(k == pl.num_programs(1) - 1)
    def _finalize():
        o_ref[...] += b2_ref[...]


# ---------------------------------------------------------------------------
# Generation-aware defaults.
# ---------------------------------------------------------------------------
def _tpu_defaults():
    vmem_phys = 128 << 20
    kind = ""
    try:
        kind = jax.devices()[0].device_kind.lower()
    except Exception:
        pass
    try:
        info = pltpu.get_tpu_info()
        vmem_phys = int(getattr(info, "vmem_capacity_bytes", vmem_phys))
    except Exception:
        if "v7" in kind:
            vmem_phys = 64 << 20
    num_tc = 2 if "v7" in kind else 1
    if vmem_phys <= (64 << 20):          # v7x-class: 64 MiB physical VMEM
        vmem_limit = 56 << 20
        bb_cap = 256
    else:                                # v5e / v6e: 128 MiB physical VMEM
        vmem_limit = 100 << 20
        bb_cap = 1024
    return vmem_limit, bb_cap, num_tc


def _vmem_use(bb, bh, F_pad, O_pad, itemsize, wbuf):
    """Approximate VMEM footprint (bytes) of one pipelined grid step."""
    x_b = 2 * bb * F_pad * itemsize          # x tile, double-buffered
    o_b = 2 * bb * O_pad * 4                 # resident f32 output tile (x2 headroom)
    w1_b = wbuf * F_pad * bh * itemsize
    w2_b = wbuf * bh * O_pad * itemsize
    bias_b = wbuf * 8 * (bh + O_pad) * 4     # (1, n) f32 blocks pad to 8 sublanes
    h_b = bb * bh * 4                        # tanh intermediate (f32)
    return x_b + o_b + w1_b + w2_b + bias_b + h_b


# ---------------------------------------------------------------------------
# Parameter preparation (call once; pads + casts weights, fixes tiling of H/F/O).
# ---------------------------------------------------------------------------
def prepare_params(w1, b1, w2, b2, *, compute_dtype=jnp.float32,
                   vmem_limit_bytes=None, block_hidden=None):
    F, H = w1.shape
    H2, O = w2.shape
    assert H2 == H and b1.shape == (H,) and b2.shape == (O,)

    vmem_limit, bb_cap, num_tc = _tpu_defaults()
    if vmem_limit_bytes is not None:
        vmem_limit = int(vmem_limit_bytes)
    budget = int(vmem_limit * 0.8)           # headroom for compiler scratch
    cdt = jnp.dtype(compute_dtype)
    itemsize = cdt.itemsize

    F_pad = _round_up(F, 128)                                # lane-dense x
    O_pad = _round_up(O, 256) if O > 128 else _round_up(O, 128)
    H128 = _round_up(H, 128)

    if block_hidden is not None:
        bh = min(_round_up(block_hidden, 128), H128)
    else:
        # Prefer resident (un-chunked) weights: single VMEM buffer, fetched once.
        bh = H128
        ref_bb = min(bb_cap, 256)
        if _vmem_use(ref_bb, bh, F_pad, O_pad, itemsize, 1) > budget:
            bh = 128
            for cand in (1024, 512, 256, 128):
                if cand < H128 and _vmem_use(ref_bb, cand, F_pad, O_pad,
                                             itemsize, 2) <= budget:
                    bh = cand
                    break
    H_pad = _round_up(H, bh)
    chunked = H_pad > bh

    # Pad + cast once (hoisted out of the per-call path). Zero padding keeps
    # padded rows/cols mathematically inert.
    w1p = jnp.pad(w1, ((0, F_pad - F), (0, H_pad - H))).astype(cdt)
    w2p = jnp.pad(w2, ((0, H_pad - H), (0, O_pad - O))).astype(cdt)
    b1p = jnp.pad(b1, (0, H_pad - H)).reshape(1, H_pad).astype(jnp.float32)
    b2p = jnp.pad(b2, (0, O_pad - O)).reshape(1, O_pad).astype(jnp.float32)

    return dict(
        w1=w1p, b1=b1p, w2=w2p, b2=b2p,
        F=F, H=H, O=O, F_pad=F_pad, H_pad=H_pad, O_pad=O_pad, bh=bh,
        chunked=chunked, compute_dtype=cdt,
        vmem_limit=vmem_limit, budget=budget, bb_cap=bb_cap, num_tc=num_tc,
    )


# ---------------------------------------------------------------------------
# Forward pass with pre-prepared params.
# ---------------------------------------------------------------------------
def single_layer_apply(params, x, *, block_batch=None):
    B, F = x.shape
    assert F == params["F"], "feature dim mismatch"
    F_pad, H_pad, O_pad = params["F_pad"], params["H_pad"], params["O_pad"]
    bh, chunked = params["bh"], params["chunked"]
    cdt = params["compute_dtype"]
    itemsize = cdt.itemsize
    budget = params["budget"]
    num_tc = params["num_tc"]

    # Extra weight buffering only matters when H is chunked (moving blocks);
    # use 3 buffers when the per-chunk compute is short (small F and O).
    wbuf = 1 if not chunked else (3 if max(F_pad, O_pad) <= 256 else 2)

    # ---- batch tile ----
    B8 = _round_up(B, 8)
    if block_batch is not None:
        bb_cap = max(8, _round_up(block_batch, 8))
    else:
        bb_cap = params["bb_cap"]
        # Give both TensorCores a batch tile on 2-TC chips.
        if num_tc >= 2 and B8 >= 16:
            bb_cap = min(bb_cap, max(8, _round_up(B8 // 2, 8)))
    bb = max(8, min(bb_cap, B8))
    while bb > 8 and _vmem_use(bb, bh, F_pad, O_pad, itemsize, wbuf) > budget:
        bb = max(8, _round_up(bb // 2, 8))
    B_pad = _round_up(B, bb)

    grid = (B_pad // bb, H_pad // bh)

    # ---- per-call input padding (only x; weights were hoisted) ----
    xp = jnp.pad(x, ((0, B_pad - B), (0, F_pad - F))).astype(cdt)

    w_nbuf = 1 if not chunked else wbuf
    in_specs = [
        pl.BlockSpec((bb, F_pad), lambda i, k: (i, 0)),
        pl.BlockSpec((F_pad, bh), lambda i, k: (0, k),
                     pipeline_mode=pl.Buffered(w_nbuf)),
        pl.BlockSpec((1, bh), lambda i, k: (0, k),
                     pipeline_mode=pl.Buffered(w_nbuf)),
        pl.BlockSpec((bh, O_pad), lambda i, k: (k, 0),
                     pipeline_mode=pl.Buffered(w_nbuf)),
        pl.BlockSpec((1, O_pad), lambda i, k: (0, 0),
                     pipeline_mode=pl.Buffered(1)),
    ]
    out_specs = pl.BlockSpec((bb, O_pad), lambda i, k: (i, 0))

    # Weights are re-streamed once per batch tile only when H is chunked.
    restream = grid[0] if chunked else 1
    weight_bytes = itemsize * (F_pad * H_pad + H_pad * O_pad) * restream
    cost = pl.CostEstimate(
        flops=2 * B_pad * (F_pad * H_pad + H_pad * O_pad),
        transcendentals=B_pad * H_pad,
        bytes_accessed=int(
            itemsize * B_pad * F_pad
            + weight_bytes
            + 4 * (H_pad + O_pad + B_pad * O_pad)
        ),
    )

    out_padded = pl.pallas_call(
        _mlp_kernel,
        out_shape=jax.ShapeDtypeStruct((B_pad, O_pad), jnp.float32),
        grid=grid,
        in_specs=in_specs,
        out_specs=out_specs,
        compiler_params=pltpu.CompilerParams(
            dimension_semantics=("parallel", "arbitrary"),
            vmem_limit_bytes=params["vmem_limit"],
        ),
        cost_estimate=cost,
    )(xp, params["w1"], params["b1"], params["w2"], params["b2"])

    # Padded batch rows / output lanes are garbage-or-zero; slice them off.
    return out_padded[:B, :params["O"]]


def single_layer_forward(x, w1, b1, w2, b2, *, compute_dtype=jnp.float32,
                         block_batch=None, block_hidden=None):
    """One-shot convenience wrapper (prepares params then applies).

    For steady-state use, call prepare_params(...) once and reuse it with
    single_layer_apply(...) to avoid re-padding/re-casting the weights.
    """
    params = prepare_params(w1, b1, w2, b2, compute_dtype=compute_dtype,
                            block_hidden=block_hidden)
    return single_layer_apply(params, x, block_batch=block_batch)


def init_params(key, n_features, n_hidden, n_output):
    """Deterministic init mimicking torch.nn.Linear default (U(+-1/sqrt(fan_in)))."""
    k1, k2, k3, k4 = jax.random.split(key, 4)
    bound1 = 1.0 / math.sqrt(n_features)
    bound2 = 1.0 / math.sqrt(n_hidden)
    # Stored directly as [in, out] (transpose of PyTorch's [out, in]).
    w1 = jax.random.uniform(k1, (n_features, n_hidden), jnp.float32, -bound1, bound1)
    b1 = jax.random.uniform(k2, (n_hidden,), jnp.float32, -bound1, bound1)
    w2 = jax.random.uniform(k3, (n_hidden, n_output), jnp.float32, -bound2, bound2)
    b2 = jax.random.uniform(k4, (n_output,), jnp.float32, -bound2, bound2)
    return w1, b1, w2, b2


if __name__ == "__main__":
    key = jax.random.PRNGKey(0)

    # Small shapes consistent with SingleLayer(n_features, n_hidden, n_output).
    B, n_features, n_hidden, n_output = 8, 16, 32, 4
    kx, kp = jax.random.split(key)
    x = jax.random.normal(kx, (B, n_features), jnp.float32)
    w1, b1, w2, b2 = init_params(kp, n_features, n_hidden, n_output)

    ref = jnp.tanh(x @ w1 + b1) @ w2 + b2

    # f32 path, steady-state API: prepare once, apply.
    params = prepare_params(w1, b1, w2, b2)
    out = jax.block_until_ready(single_layer_apply(params, x))
    assert out.shape == (B, n_output)
    assert jnp.allclose(out, ref, atol=1e-4, rtol=1e-4)

    # bf16 MXU-input path (f32 accumulation / bias / tanh) -> looser tolerance.
    out_bf16 = jax.block_until_ready(
        single_layer_forward(x, w1, b1, w2, b2, compute_dtype=jnp.bfloat16)
    )
    assert jnp.allclose(out_bf16, ref, atol=3e-2, rtol=3e-2)

    # Ragged / multi-tile case: exercises batch tiling, hidden chunking,
    # lane padding, Buffered(3) weight chunks and the in-place out accumulation.
    B2, F2, H2, O2 = 300, 20, 200, 10
    kx2, kp2 = jax.random.split(jax.random.PRNGKey(1))
    x2 = jax.random.normal(kx2, (B2, F2), jnp.float32)
    w1b, b1b, w2b, b2b = init_params(kp2, F2, H2, O2)
    ref2 = jnp.tanh(x2 @ w1b + b1b) @ w2b + b2b
    out2 = jax.block_until_ready(
        single_layer_forward(
            x2, w1b, b1b, w2b, b2b, block_batch=128, block_hidden=128
        )
    )
    assert out2.shape == (B2, O2)
    assert jnp.allclose(out2, ref2, atol=5e-4, rtol=5e-4)

    print("KERNEL_OK")
</pallas_src>

<mosaic_0001>
module attributes {stable_mosaic.version = 11 : i64} {
  func.func @_mlp_kernel(%arg0: i32, %arg1: i32, %arg2: memref<8x128xf32, #tpu.memory_space<vmem>>, %arg3: memref<128x128xf32, #tpu.memory_space<vmem>>, %arg4: memref<1x128xf32, #tpu.memory_space<vmem>>, %arg5: memref<128x128xf32, #tpu.memory_space<vmem>>, %arg6: memref<1x128xf32, #tpu.memory_space<vmem>>, %arg7: memref<8x128xf32, #tpu.memory_space<vmem>>) attributes {dimension_semantics = [#tpu.dimension_semantics<parallel>, #tpu.dimension_semantics<arbitrary>], iteration_bounds = array<i64: 1, 1>, scalar_prefetch = 0 : i64, scratch_operands = 0 : i64, tpu.core_type = #tpu.core_type<tc>, window_params = [{transform_indices = @transform_0, window_bounds = array<i64: 8, 128>}, {pipeline_mode = #tpu.pipeline_mode<synchronous>, transform_indices = @transform_1, window_bounds = array<i64: 128, 128>}, {pipeline_mode = #tpu.pipeline_mode<synchronous>, transform_indices = @transform_2, window_bounds = array<i64: 1, 128>}, {pipeline_mode = #tpu.pipeline_mode<synchronous>, transform_indices = @transform_3, window_bounds = array<i64: 128, 128>}, {pipeline_mode = #tpu.pipeline_mode<synchronous>, transform_indices = @transform_4, window_bounds = array<i64: 1, 128>}, {transform_indices = @transform_5, window_bounds = array<i64: 8, 128>}]} {
    %c0_i32 = arith.constant 0 : i32
    %0 = arith.cmpi eq, %arg1, %c0_i32 : i32
    %1 = arith.extui %0 : i1 to i32
    %c0_i32_0 = arith.constant 0 : i32
    %2 = arith.cmpi ne, %1, %c0_i32_0 : i32
    scf.if %2 {
      %cst_15 = arith.constant 0.000000e+00 : f32
      %18 = vector.broadcast %cst_15 : f32 to vector<8x128xf32>
      %c0_16 = arith.constant 0 : index
      %c0_17 = arith.constant 0 : index
      %19 = vector.load %arg7[%c0_16, %c0_17] : memref<8x128xf32, #tpu.memory_space<vmem>>, vector<8x128xf32>
      tpu.vector_store %arg7[%c0_16, %c0_17], %18 {strides = array<i32>} : memref<8x128xf32, #tpu.memory_space<vmem>>, vector<8x128xf32>,
    } else {
    }
    %c0 = arith.constant 0 : index
    %c0_1 = arith.constant 0 : index
    %3 = vector.load %arg2[%c0, %c0_1] : memref<8x128xf32, #tpu.memory_space<vmem>>, vector<8x128xf32>
    %c0_2 = arith.constant 0 : index
    %c0_3 = arith.constant 0 : index
    %4 = vector.load %arg3[%c0_2, %c0_3] : memref<128x128xf32, #tpu.memory_space<vmem>>, vector<128x128xf32>
    %cst = arith.constant dense<0.000000e+00> : vector<8x128xf32>
    %5 = tpu.matmul %3, %4, %cst {dimension_numbers = #tpu.dot_dimension_numbers<[1], [0], [0], [1], [0, 0, 1, 1], [], []>, precision = #tpu.contract_precision<fp32>} : vector<8x128xf32>, vector<128x128xf32>, vector<8x128xf32> -> vector<8x128xf32>
    %c0_4 = arith.constant 0 : index
    %c0_5 = arith.constant 0 : index
    %6 = vector.load %arg4[%c0_4, %c0_5] : memref<1x128xf32, #tpu.memory_space<vmem>>, vector<1x128xf32>
    %7 = vector.broadcast %6 : vector<1x128xf32> to vector<8x128xf32>
    %8 = arith.addf %5, %7 : vector<8x128xf32>
    %9 = math.tanh %8 : vector<8x128xf32>
    %c0_6 = arith.constant 0 : index
    %c0_7 = arith.constant 0 : index
    %10 = vector.load %arg7[%c0_6, %c0_7] : memref<8x128xf32, #tpu.memory_space<vmem>>, vector<8x128xf32>
    %c0_8 = arith.constant 0 : index
    %c0_9 = arith.constant 0 : index
    %11 = vector.load %arg5[%c0_8, %c0_9] : memref<128x128xf32, #tpu.memory_space<vmem>>, vector<128x128xf32>
    %cst_10 = arith.constant dense<0.000000e+00> : vector<8x128xf32>
    %12 = tpu.matmul %9, %11, %cst_10 {dimension_numbers = #tpu.dot_dimension_numbers<[1], [0], [0], [1], [0, 0, 1, 1], [], []>, precision = #tpu.contract_precision<fp32>} : vector<8x128xf32>, vector<128x128xf32>, vector<8x128xf32> -> vector<8x128xf32>
    %13 = arith.addf %10, %12 : vector<8x128xf32>
    %c0_11 = arith.constant 0 : index
    %c0_12 = arith.constant 0 : index
    %14 = vector.load %arg7[%c0_11, %c0_12] : memref<8x128xf32, #tpu.memory_space<vmem>>, vector<8x128xf32>
    tpu.vector_store %arg7[%c0_11, %c0_12], %13 {strides = array<i32>} : memref<8x128xf32, #tpu.memory_space<vmem>>, vector<8x128xf32>,
    %c0_i32_13 = arith.constant 0 : i32
    %15 = arith.cmpi eq, %arg1, %c0_i32_13 : i32
    %16 = arith.extui %15 : i1 to i32
    %c0_i32_14 = arith.constant 0 : i32
    %17 = arith.cmpi ne, %16, %c0_i32_14 : i32
    scf.if %17 {
      %c0_15 = arith.constant 0 : index
      %c0_16 = arith.constant 0 : index
      %18 = vector.load %arg7[%c0_15, %c0_16] : memref<8x128xf32, #tpu.memory_space<vmem>>, vector<8x128xf32>
      %c0_17 = arith.constant 0 : index
      %c0_18 = arith.constant 0 : index
      %19 = vector.load %arg6[%c0_17, %c0_18] : memref<1x128xf32, #tpu.memory_space<vmem>>, vector<1x128xf32>
      %20 = vector.broadcast %19 : vector<1x128xf32> to vector<8x128xf32>
      %21 = arith.addf %18, %20 : vector<8x128xf32>
      %c0_19 = arith.constant 0 : index
      %c0_20 = arith.constant 0 : index
      %22 = vector.load %arg7[%c0_19, %c0_20] : memref<8x128xf32, #tpu.memory_space<vmem>>, vector<8x128xf32>
      tpu.vector_store %arg7[%c0_19, %c0_20], %21 {strides = array<i32>} : memref<8x128xf32, #tpu.memory_space<vmem>>, vector<8x128xf32>,
    } else {
    }
    return
  }
  func.func @transform_0(%arg0: i32, %arg1: i32) -> (i32, i32) {
    %c0_i32 = arith.constant 0 : i32
    %c0_i32_0 = arith.constant 0 : i32
    return %arg0, %c0_i32 : i32, i32
  }
  func.func @transform_1(%arg0: i32, %arg1: i32) -> (i32, i32) {
    %c0_i32 = arith.constant 0 : i32
    %c0_i32_0 = arith.constant 0 : i32
    return %c0_i32, %arg1 : i32, i32
  }
  func.func @transform_2(%arg0: i32, %arg1: i32) -> (i32, i32) {
    %c0_i32 = arith.constant 0 : i32
    %c0_i32_0 = arith.constant 0 : i32
    return %c0_i32, %arg1 : i32, i32
  }
  func.func @transform_3(%arg0: i32, %arg1: i32) -> (i32, i32) {
    %c0_i32 = arith.constant 0 : i32
    %c0_i32_0 = arith.constant 0 : i32
    return %arg1, %c0_i32 : i32, i32
  }
  func.func @transform_4(%arg0: i32, %arg1: i32) -> (i32, i32) {
    %c0_i32 = arith.constant 0 : i32
    %c0_i32_0 = arith.constant 0 : i32
    %c0_i32_1 = arith.constant 0 : i32
    return %c0_i32, %c0_i32_0 : i32, i32
  }
  func.func @transform_5(%arg0: i32, %arg1: i32) -> (i32, i32) {
    %c0_i32 = arith.constant 0 : i32
    %c0_i32_0 = arith.constant 0 : i32
    return %arg0, %c0_i32 : i32, i32
  }
}

</mosaic_0001>

<bundles_post_ra>
// kernel: tpu_custom_call.1
= control target key start
LH: loop header
LB: loop body
LE: loop exit
PB: predicated region body
PF: predicated region fallthrough
CT: control target
= control target key end

     0   :  { %10 = vsyncpa [#allocation3], 0  ;;  %s3110_s0 = inlined_call_operand.hbm [shape: f32[8,128], index: 0, kind: input, shape index: {}]   ;;  %s3111_s1 = inlined_call_operand.hbm [shape: f32[128,128], index: 1, kind: input, shape index: {}]   ;;  %s3112_s2 = inlined_call_operand.hbm [shape: f32[1,128], index: 2, kind: input, shape index: {}]   ;;  %s3113_s3 = inlined_call_operand.hbm [shape: f32[128,128], index: 3, kind: input, shape index: {}]   ;;  %s3114_s4 = inlined_call_operand.hbm [shape: f32[1,128], index: 4, kind: input, shape index: {}]   ;;  %s3115_s5 = inlined_call_operand.hbm [shape: f32[8,128], index: 5, kind: output, shape index: {}]  }
   0x1   :  { %11 = vsyncpa [#allocation6], 0 }
   0x2   :  { %12 = vsyncpa [#allocation9], 0 }
   0x3   :  { %13 = vsyncpa [#allocation4], 0  ;;  %s2522_s18 = smov [#allocation5]   ;;  %s2382_s22 = scalar_lea.hbm %s3111_s1, 2048 }
   0x4   :  { %s29_s19 = sshll.u32 %s2522_s18, 4  ;;  %p2383_p0 = scmp.ne.s32.totalorder %s3111_s1, %s2382_s22  ;;  %s30_s19 = int_to_ptr.vmem [resolvable:$true] %s29_s19 }
   0x5   :  { %p2386_p1 = scmp.lt.u32.totalorder %s2382_s22, %s3111_s1 }
   0x7   :  { %p2388_p2 = pnand %p2386_p1, %p2383_p0 }
   0x9   :  { %2391 = shalt.err (!%p2388_p2)
}
   0xa   :  { %s2392_s27 = scalar_lea.vmem %s30_s19, 2048  ;;  %p2397_p4 = scmp.lt.s32.totalorder %s30_s19, %s30_s19 }
   0xb   :  { %p2393_p3 = scmp.ne.s32.totalorder %s30_s19, %s2392_s27  ;;  %p2398_p5 = scmp.lt.s32.totalorder %s2392_s27, %s2392_s27 }
   0xd   :  { %p2399_p6 = por %p2398_p5, %p2397_p4 }
   0xf   :  { %p2400_p7 = pnand %p2399_p6, %p2393_p3 }
  0x11   :  { %2403 = shalt.err (!%p2400_p7)
}
  0x12   :  { %s2523_s28 = smov 128   ;;  %s2524_s29 = smov 8  }
  0x13   :  { %35 = dma.hbm_to_vmem [thread:$0]  %s3111_s1, 2048, %s30_s19, [#allocation6], %s2523_s28, %s2523_s28, %s2524_s29  }
  0x14   :  { %s2525_s7 = smov [#allocation8]   ;;  %s2526_s9 = smov [#allocation2]  }
  0x15   :  { %s51_s8 = sshll.u32 %s2525_s7, 4  ;;  %s20_s10 = sshll.u32 %s2526_s9, 4  ;;  %s52_s8 = int_to_ptr.vmem [resolvable:$true] %s51_s8  ;;  %s21_s10 = int_to_ptr.vmem [resolvable:$true] %s20_s10 }
  0x16   :  { %s2404_s13 = scalar_lea.hbm %s3113_s3, 2048 }
  0x17   :  { %p2405_p8 = scmp.ne.s32.totalorder %s3113_s3, %s2404_s13  ;;  %p2408_p9 = scmp.lt.u32.totalorder %s2404_s13, %s3113_s3 }
  0x19   :  { %p2410_p10 = pnand %p2408_p9, %p2405_p8 }
  0x1b   :  { %2413 = shalt.err (!%p2410_p10)
}
  0x1c   :  { %s2414_s1 = scalar_lea.vmem %s52_s8, 2048  ;;  %p2419_p12 = scmp.lt.s32.totalorder %s52_s8, %s52_s8 }
  0x1d   :  { %p2415_p11 = scmp.ne.s32.totalorder %s52_s8, %s2414_s1  ;;  %p2420_p13 = scmp.lt.s32.totalorder %s2414_s1, %s2414_s1 }
  0x1f   :  { %p2421_p0 = por %p2420_p13, %p2419_p12 }
  0x21   :  { %p2422_p1 = pnand %p2421_p0, %p2415_p11 }
  0x23   :  { %2425 = shalt.err (!%p2422_p1)
}
  0x24   :  { %57 = dma.hbm_to_vmem [thread:$0]  %s3113_s3, 2048, %s52_s8, [#allocation9], %s2523_s28, %s2523_s28, %s2524_s29  }
  0x25   :  { %s2426_s22 = scalar_lea.hbm %s3110_s0, 128 }
  0x26   :  { %p2427_p2 = scmp.ne.s32.totalorder %s3110_s0, %s2426_s22  ;;  %p2430_p3 = scmp.lt.u32.totalorder %s2426_s22, %s3110_s0 }
  0x28   :  { %p2432_p4 = pnand %p2430_p3, %p2427_p2 }
  0x2a   :  { %2435 = shalt.err (!%p2432_p4)
}
  0x2b   :  { %s2436_s27 = scalar_lea.vmem %s21_s10, 128  ;;  %p2441_p6 = scmp.lt.s32.totalorder %s21_s10, %s21_s10 }
  0x2c   :  { %p2437_p5 = scmp.ne.s32.totalorder %s21_s10, %s2436_s27  ;;  %p2442_p7 = scmp.lt.s32.totalorder %s2436_s27, %s2436_s27 }
  0x2e   :  { %p2443_p8 = por %p2442_p7, %p2441_p6 }
  0x30   :  { %p2444_p9 = pnand %p2443_p8, %p2437_p5 }
  0x32   :  { %2447 = shalt.err (!%p2444_p9)
}
  0x33   :  { %23 = dma.hbm_to_vmem [thread:$0]  %s3110_s0, 128, %s21_s10, [#allocation3]  }
  0x34   :  { %s2527_s29 = smov [#allocation7]   ;;  %s2528_s6 = smov [#allocation10]  }
  0x35   :  { %s42_s30 = sshll.u32 %s2527_s29, 4  ;;  %s64_s7 = sshll.u32 %s2528_s6, 4  ;;  %s43_s30 = int_to_ptr.vmem [resolvable:$true] %s42_s30  ;;  %s65_s7 = int_to_ptr.vmem [resolvable:$true] %s64_s7 }
  0x36   :  { %s2448_s11 = scalar_lea.hbm %s3112_s2, 16 }
  0x37   :  { %p2449_p10 = scmp.ne.s32.totalorder %s3112_s2, %s2448_s11  ;;  %p2452_p11 = scmp.lt.u32.totalorder %s2448_s11, %s3112_s2 }
  0x39   :  { %p2454_p12 = pnand %p2452_p11, %p2449_p10 }
  0x3b   :  { %2457 = shalt.err (!%p2454_p12)
}
  0x3c   :  { %s2458_s0 = scalar_lea.vmem %s43_s30, 16  ;;  %s2462_s10 = scalar_lea.vmem %s43_s30, 32 }
  0x3d   :  { %p2459_p13 = scmp.ne.s32.totalorder %s43_s30, %s2458_s0  ;;  %p2463_p0 = scmp.lt.s32.totalorder %s43_s30, %s43_s30 }
  0x3e   :  { %p2464_p1 = scmp.lt.s32.totalorder %s2462_s10, %s2458_s0 }
  0x40   :  { %p2465_p2 = por %p2464_p1, %p2463_p0 }
  0x42   :  { %p2466_p3 = pnand %p2465_p2, %p2459_p13 }
  0x44   :  { %2469 = shalt.err (!%p2466_p3)
}
  0x45   :  { %45 = dma.hbm_to_vmem [thread:$0]  %s3112_s2, 16, %s43_s30, [#allocation6]  }
  0x46   :  { %s2470_s19 = scalar_lea.hbm %s3114_s4, 16 }
  0x47   :  { %p2471_p4 = scmp.ne.s32.totalorder %s3114_s4, %s2470_s19  ;;  %p2474_p5 = scmp.lt.u32.totalorder %s2470_s19, %s3114_s4 }
  0x49   :  { %p2476_p6 = pnand %p2474_p5, %p2471_p4 }
  0x4b   :  { %2479 = shalt.err (!%p2476_p6)
}
  0x4c   :  { %s2480_s24 = scalar_lea.vmem %s65_s7, 16  ;;  %s2484_s25 = scalar_lea.vmem %s65_s7, 32 }
  0x4d   :  { %p2481_p7 = scmp.ne.s32.totalorder %s65_s7, %s2480_s24  ;;  %p2485_p8 = scmp.lt.s32.totalorder %s65_s7, %s65_s7 }
  0x4e   :  { %p2486_p9 = scmp.lt.s32.totalorder %s2484_s25, %s2480_s24 }
  0x50   :  { %p2487_p10 = por %p2486_p9, %p2485_p8 }
  0x52   :  { %p2488_p11 = pnand %p2487_p10, %p2481_p7 }
  0x54   :  { %2491 = shalt.err (!%p2488_p11)
}
  0x55   :  { %67 = dma.hbm_to_vmem [thread:$0]  %s3114_s4, 16, %s65_s7, [#allocation9]  }
  0x56   :  { %2514 = dma.done.wait [#allocation3], 128  }
  0x57   :  { %2515 = vsyncadd [#allocation3], 4294967168 }
  0x58   :  { %2516 = dma.done.wait [#allocation6], 2064  }
  0x59   :  { %2517 = vsyncadd [#allocation6], 4294965232 }
  0x5a   :  { %2518 = dma.done.wait [#allocation9], 2064  }
  0x5b   :  { %2519 = vsyncadd [#allocation9], 4294965232  ;;  %v2529_v0 = vmov 0.0|0.0   ;;  %vm2530_vm0 = vmmov 0   ;;  %v2531_v1 = vmov 0.0   ;;  %v89_v2 = vld [vmem:[#allocation5] sm:$0xff] }
  0x5c   :  { %2070 = vmatprep.subr.bf16.mxu0 %v2529_v0  ;;  %1682 = vmatprep.mubr.msk.f32.mxu0 %vm2530_vm0, %v2531_v1  ;;  %v90_v3 = vld [vmem:[#allocation5 + $0x8] sm:$0xff]  ;;  %v91_v4 = vld [vmem:[#allocation5 + $0x10] sm:$0xff]  ;;  %v113_v5 = vand.u32 4294901760, %v89_v2  ;;  %v92_v7 = vld [vmem:[#allocation5 + $0x18] sm:$0xff]  ;;  %s2532_s4 = smov [#allocation11]  }
  0x5d   :  { %2214 = vmatprep.subr.bf16.mxu1 %v2529_v0  ;;  %1892 = vmatprep.mubr.msk.f32.mxu1 %vm2530_vm0, %v2531_v1  ;;  %v116_v6 = vand.u32 4294901760, %v90_v3  ;;  %v119_v8 = vand.u32 4294901760, %v91_v4  ;;  %v122_v9 = vand.u32 4294901760, %v92_v7  ;;  %v93_v10 = vld [vmem:[#allocation5 + $0x20] sm:$0xff]  ;;  %v94_v11 = vld [vmem:[#allocation5 + $0x28] sm:$0xff]  ;;  %v95_v16 = vld [vmem:[#allocation5 + $0x30] sm:$0xff] }
  0x5e   :  { %v125_v14 = vand.u32 4294901760, %v93_v10  ;;  %v128_v15 = vand.u32 4294901760, %v94_v11  ;;  %v96_v17 = vld [vmem:[#allocation5 + $0x38] sm:$0xff]  ;;  %v131_v19 = vand.u32 4294901760, %v95_v16  ;;  %v97_v21 = vld [vmem:[#allocation5 + $0x40] sm:$0xff]  ;;  %v98_v22 = vld [vmem:[#allocation5 + $0x48] sm:$0xff]  ;;  %v2639_v24 = vsub.f32 %v89_v2, %v113_v5 }
  0x5f   :  { %v2629_v12 = vpack.c.bf16 %v116_v6, %v113_v5  ;;  %v2632_v13 = vpack.c.bf16 %v122_v9, %v119_v8  ;;  %v134_v20 = vand.u32 4294901760, %v96_v17  ;;  %v88_v23 = vld [vmem:[#allocation2] sm:$0xff]  ;;  %v2641_v25 = vsub.f32 %v90_v3, %v116_v6  ;;  %v99_v29 = vld [vmem:[#allocation5 + $0x50] sm:$0xff]  ;;  %v101_v32 = vld [vmem:[#allocation5 + $0x60] sm:$0xff]  ;;  %s1433_s27 = sshll.u32 %s2532_s4, 4  ;;  %s1434_s27 = int_to_ptr.vmem [resolvable:$true] %s1433_s27 }
  0x60   :  { %v2636_v18 = vpack.c.bf16 %v128_v15, %v125_v14  ;;  %v137_v27 = vand.u32 4294901760, %v97_v21  ;;  %v140_v28 = vand.u32 4294901760, %v98_v22  ;;  %v100_v30 = vld [vmem:[#allocation5 + $0x58] sm:$0xff]  ;;  %v2647_v31 = vand.u32 4294901760, %v88_v23  ;;  %v102_v35 = vld [vmem:[#allocation5 + $0x68] sm:$0xff]  ;;  %v103_v36 = vld [vmem:[#allocation5 + $0x70] sm:$0xff]  ;;  %p2497_p13 = scmp.lt.s32.totalorder %s1434_s27, %s1434_s27 }
  0x61   :  { %2072 = vmatpush3.bf16.msra.mxu0 %v2629_v12  ;;  %v2644_v26 = vpack.c.bf16 %v134_v20, %v131_v19  ;;  %v2649_v33 = vsub.f32 %v91_v4, %v119_v8  ;;  %v143_v34 = vand.u32 4294901760, %v99_v29  ;;  %v104_v37 = vld [vmem:[#allocation5 + $0x78] sm:$0xff]  ;;  %v146_v39 = vand.u32 4294901760, %v100_v30  ;;  %s2492_s3 = scalar_lea.vmem %s1434_s27, 128 }
  0x62   :  { %2073 = vmatprep.subr.bf16.mxu0 %v2529_v0  ;;  %v2652_v38 = vpack.c.bf16 %v140_v28, %v137_v27  ;;  %v206_v40 = vand.u32 4294901760, %v2639_v24  ;;  %v213_v41 = vand.u32 4294901760, %v2641_v25  ;;  %v2656_v42 = vsub.f32 %v92_v7, %v122_v9  ;;  %p2493_p12 = scmp.ne.s32.totalorder %s1434_s27, %s2492_s3  ;;  %p2498_p0 = scmp.lt.s32.totalorder %s2492_s3, %s2492_s3 }
  0x63   :  { %v2658_v43 = vsub.f32 %v93_v10, %v125_v14  ;;  %v2660_v44 = vsub.f32 %v94_v11, %v128_v15  ;;  %v2664_v45 = vsub.f32 %v88_v23, %v2647_v31  ;;  %v149_v46 = vand.u32 4294901760, %v101_v32 }
  0x64   :  { %v152_v47 = vand.u32 4294901760, %v102_v35  ;;  %v155_v48 = vand.u32 4294901760, %v103_v36  ;;  %v158_v49 = vand.u32 4294901760, %v104_v37  ;;  %v2666_v50 = vsub.f32 %v95_v16, %v131_v19  ;;  %p2499_p1 = por %p2498_p0, %p2497_p13 }
  0x65   :  { %2075 = vmatpush3.bf16.msra.mxu0 %v2632_v13  ;;  %v2668_v51 = vsub.f32 %v96_v17, %v134_v20  ;;  %v2670_v52 = vsub.f32 %v97_v21, %v137_v27  ;;  %v220_v53 = vand.u32 4294901760, %v2649_v33  ;;  %v2674_v54 = vsub.f32 %v98_v22, %v140_v28 }
  0x66   :  { %2076 = vmatprep.subr.bf16.mxu0 %v2529_v0  ;;  %v2676_v55 = vpack.c.bf16 %v146_v39, %v143_v34  ;;  %v207_v56 = vsub.f32 %v2639_v24, %v206_v40  ;;  %v214_v57 = vsub.f32 %v2641_v25, %v213_v41  ;;  %v2681_v58 = vsub.f32 %v99_v29, %v143_v34  ;;  %p2500_p2 = pnand %p2499_p1, %p2493_p12 }
  0x67   :  { %v2683_v59 = vsub.f32 %v100_v30, %v146_v39  ;;  %v2685_v60 = vsub.f32 %v101_v32, %v149_v46  ;;  %v195_v61 = vand.u32 4294901760, %v2664_v45  ;;  %v2688_v62 = vpack.c.bf16 %v152_v47, %v149_v46 }
  0x68   :  { %v2690_v63 = vsub.f32 %v102_v35, %v152_v47  ;;  %v2692_v2 = vpack.c.bf16 %v158_v49, %v155_v48  ;;  %v2694_v3 = vsub.f32 %v103_v36, %v155_v48  ;;  %v2696_v4 = vsub.f32 %v104_v37, %v158_v49 }
  0x69   :  { %2078 = vmatpush3.bf16.msra.mxu0 %v2636_v18  ;;  %v221_v5 = vsub.f32 %v2649_v33, %v220_v53  ;;  %v227_v6 = vand.u32 4294901760, %v2656_v42  ;;  %v234_v7 = vand.u32 4294901760, %v2658_v43  ;;  %v208_v8 = vand.u32 4294901760, %v207_v56 }
  0x6a   :  { %2079 = vmatprep.subr.bf16.mxu0 %v2529_v0  ;;  %v215_v9 = vand.u32 4294901760, %v214_v57  ;;  %v241_v10 = vand.u32 4294901760, %v2660_v44  ;;  %v248_v11 = vand.u32 4294901760, %v2666_v50  ;;  %v196_v14 = vsub.f32 %v2664_v45, %v195_v61 }
  0x6b   :  { %v255_v15 = vand.u32 4294901760, %v2668_v51  ;;  %v262_v16 = vand.u32 4294901760, %v2670_v52  ;;  %v269_v17 = vand.u32 4294901760, %v2674_v54  ;;  %v276_v19 = vand.u32 4294901760, %v2681_v58 }
  0x6c   :  { %v283_v20 = vand.u32 4294901760, %v2683_v59  ;;  %v290_v21 = vand.u32 4294901760, %v2685_v60  ;;  %v297_v22 = vand.u32 4294901760, %v2690_v63  ;;  %v304_v23 = vand.u32 4294901760, %v2694_v3 }
  0x6d   :  { %2081 = vmatpush3.bf16.msra.mxu0 %v2644_v26  ;;  %v311_v27 = vand.u32 4294901760, %v2696_v4  ;;  %v2717_v28 = vpack.c.bf16 %v213_v41, %v206_v40  ;;  %v2719_v29 = vpack.c.bf16 %v227_v6, %v220_v53  ;;  %v228_v30 = vsub.f32 %v2656_v42, %v227_v6 }
  0x6e   :  { %2082 = vmatprep.subr.bf16.mxu0 %v2529_v0  ;;  %v2723_v32 = vpack.c.bf16 %v241_v10, %v234_v7  ;;  %v2725_v34 = vpack.c.bf16 %v255_v15, %v248_v11  ;;  %v2727_v35 = vpack.c.bf16 %v269_v17, %v262_v16  ;;  %v2730_v36 = vpack.c.bf16 %v283_v20, %v276_v19 }
  0x6f   :  { %v2732_v37 = vpack.c.bf16 %v297_v22, %v290_v21  ;;  %v2734_v39 = vpack.c.bf16 %v311_v27, %v304_v23  ;;  %v197_v40 = vand.u32 4294901760, %v196_v14  ;;  %v222_v41 = vand.u32 4294901760, %v221_v5 }
  0x70   :  { %v2095_v46 = vpack.c.bf16 %v215_v9, %v208_v8  ;;  %v229_v47 = vand.u32 4294901760, %v228_v30  ;;  %v235_v48 = vsub.f32 %v2658_v43, %v234_v7  ;;  %v242_v49 = vsub.f32 %v2660_v44, %v241_v10 }
  0x71   :  { %2084 = vmatpush3.bf16.msra.mxu0 %v2652_v38  ;;  %v249_v53 = vsub.f32 %v2666_v50, %v248_v11  ;;  %v256_v14 = vsub.f32 %v2668_v51, %v255_v15  ;;  %v263_v5 = vsub.f32 %v2670_v52, %v262_v16  ;;  %v270_v10 = vsub.f32 %v2674_v54, %v269_v17 }
  0x72   :  { %2085 = vmatprep.subr.bf16.mxu0 %v2529_v0  ;;  %v2098_v56 = vpack.c.bf16 %v229_v47, %v222_v41  ;;  %v236_v57 = vand.u32 4294901760, %v235_v48  ;;  %v243_v6 = vand.u32 4294901760, %v242_v49  ;;  %v277_v15 = vsub.f32 %v2681_v58, %v276_v19 }
  0x73   :  { %v250_v8 = vand.u32 4294901760, %v249_v53  ;;  %v257_v9 = vand.u32 4294901760, %v256_v14  ;;  %v264_v11 = vand.u32 4294901760, %v263_v5  ;;  %v284_v41 = vsub.f32 %v2683_v59, %v283_v20  ;;  %v757_v5 = vld [vmem:[#allocation8 + $0x10] sm:$0xff] }
  0x74   :  { %v2101_v7 = vpack.c.bf16 %v243_v6, %v236_v57  ;;  %v291_v16 = vsub.f32 %v2685_v60, %v290_v21  ;;  %v278_v47 = vand.u32 4294901760, %v277_v15  ;;  %v298_v17 = vsub.f32 %v2690_v63, %v297_v22 }
  0x75   :  { %2087 = vmatpush3.bf16.msra.mxu0 %v2676_v55  ;;  %v2104_v30 = vpack.c.bf16 %v257_v9, %v250_v8  ;;  %v285_v48 = vand.u32 4294901760, %v284_v41  ;;  %v305_v19 = vsub.f32 %v2694_v3, %v304_v23  ;;  %v312_v20 = vsub.f32 %v2696_v4, %v311_v27  ;;  %v755_v23 = vld [vmem:[#allocation8] sm:$0xff]  ;;  %v756_v27 = vld [vmem:[#allocation8 + $0x8] sm:$0xff] }
  0x76   :  { %2088 = vmatprep.subr.bf16.mxu0 %v2529_v0  ;;  %v292_v49 = vand.u32 4294901760, %v291_v16  ;;  %v2119_v14 = vpack.c.bf16 %v2641_v25, %v2639_v24  ;;  %v772_v8 = vand.u32 4294901760, %v755_v23  ;;  %v775_v9 = vand.u32 4294901760, %v756_v27 }
  0x77   :  { %v2110_v53 = vpack.c.bf16 %v285_v48, %v278_v47  ;;  %v306_v57 = vand.u32 4294901760, %v305_v19  ;;  %v313_v6 = vand.u32 4294901760, %v312_v20  ;;  %v2128_v16 = vpack.c.bf16 %v2668_v51, %v2666_v50  ;;  %v769_v47 = vld [vmem:[#allocation8 + $0x70] sm:$0xff]  ;;  %v770_v48 = vld [vmem:[#allocation8 + $0x78] sm:$0xff] }
  0x78   :  { %v2768_v25 = vpack.c.bf16 %v775_v9, %v772_v8  ;;  %v2137_v50 = vpack.c.bf16 %v2690_v63, %v2685_v60  ;;  %v2140_v51 = vpack.c.bf16 %v2696_v4, %v2694_v3  ;;  %v764_v60 = vld [vmem:[#allocation8 + $0x48] sm:$0xff]  ;;  %v765_v63 = vld [vmem:[#allocation8 + $0x50] sm:$0xff] }
  0x79   :  { %2090 = vmatpush3.bf16.msra.mxu0 %v2688_v62  ;;  %v2116_v22 = vpack.c.bf16 %v313_v6, %v306_v57  ;;  %v802_v3 = vand.u32 4294901760, %v765_v63  ;;  %v814_v57 = vand.u32 4294901760, %v769_v47  ;;  %v817_v6 = vand.u32 4294901760, %v770_v48 }
  0x7a   :  { %2091 = vmatprep.subr.bf16.mxu0 %v2529_v0  ;;  %2216 = vmatpush3.bf16.msra.mxu1 %v2768_v25 }
  0x7b   :  { %2217 = vmatprep.subr.bf16.mxu1 %v2529_v0 }
  0x7d   :  { %2093 = vmatpush3.bf16.msra.mxu0 %v2692_v2 }
  0x7e   :  { %2094 = vmatprep.subr.bf16.mxu0 %v2529_v0 }
  0x80   :  { %1683 = vmatmul.mubr.f32.vlgmr.msra.gmra.mrb[0].mxu0 %v197_v40  ;;  %v271_v40 = vand.u32 4294901760, %v270_v10  ;;  %v758_v10 = vld [vmem:[#allocation8 + $0x18] sm:$0xff] }
  0x81   :  { %2096 = vmatpush3.bf16.msra.mxu0 %v2095_v46  ;;  %1717 = vmatprep.mubr.msk.f32.mxu0 %vm2530_vm0, %v2531_v1  ;;  %v781_v24 = vand.u32 4294901760, %v758_v10 }
  0x82   :  { %2097 = vmatprep.subr.bf16.mxu0 %v2529_v0  ;;  %v2107_v46 = vpack.c.bf16 %v271_v40, %v264_v11  ;;  %v778_v11 = vand.u32 4294901760, %v757_v5  ;;  %v2772_v40 = vsub.f32 %v756_v27, %v775_v9  ;;  %v2905_v27 = vpack.c.bf16 %v817_v6, %v814_v57 }
  0x83   :  { %v2776_v41 = vsub.f32 %v758_v10, %v781_v24 }
  0x84   :  { %v2774_v15 = vsub.f32 %v757_v5, %v778_v11  ;;  %v2907_v5 = vsub.f32 %v770_v48, %v817_v6 }
  0x85   :  { %2099 = vmatpush3.bf16.msra.mxu0 %v2098_v56  ;;  %v299_v56 = vand.u32 4294901760, %v298_v17 }
  0x86   :  { %2100 = vmatprep.subr.bf16.mxu0 %v2529_v0 }
  0x87   :  { %v2113_v21 = vpack.c.bf16 %v299_v56, %v292_v49 }
  0x89   :  { %2102 = vmatpush3.bf16.msra.mxu0 %v2101_v7  ;;  %v2122_v7 = vpack.c.bf16 %v2656_v42, %v2649_v33  ;;  %v2125_v33 = vpack.c.bf16 %v2660_v44, %v2658_v43  ;;  %v2781_v42 = vpack.c.bf16 %v781_v24, %v778_v11  ;;  %v2131_v43 = vpack.c.bf16 %v2674_v54, %v2670_v52  ;;  %v762_v52 = vld [vmem:[#allocation8 + $0x38] sm:$0xff] }
  0x8a   :  { %2103 = vmatprep.subr.bf16.mxu0 %v2529_v0  ;;  %v2134_v44 = vpack.c.bf16 %v2683_v59, %v2681_v58  ;;  %v763_v59 = vld [vmem:[#allocation8 + $0x40] sm:$0xff]  ;;  %v879_v11 = vand.u32 4294901760, %v2774_v15  ;;  %v886_v24 = vand.u32 4294901760, %v2776_v41 }
  0x8b   :  { %2219 = vmatpush3.bf16.msra.mxu1 %v2781_v42 }
  0x8c   :  { %2220 = vmatprep.subr.bf16.mxu1 %v2529_v0 }
  0x8d   :  { %2105 = vmatpush3.bf16.msra.mxu0 %v2104_v30  ;;  %v2770_v30 = vsub.f32 %v755_v23, %v772_v8  ;;  %v2902_v23 = vsub.f32 %v769_v47, %v814_v57 }
  0x8e   :  { %2106 = vmatprep.subr.bf16.mxu0 %v2529_v0 }
  0x91   :  { %2108 = vmatpush3.bf16.msra.mxu0 %v2107_v46 }
  0x92   :  { %2109 = vmatprep.subr.bf16.mxu0 %v2529_v0 }
  0x95   :  { %2111 = vmatpush3.bf16.msra.mxu0 %v2110_v53  ;;  %v2889_v53 = vsub.f32 %v765_v63, %v802_v3 }
  0x96   :  { %2112 = vmatprep.subr.bf16.mxu0 %v2529_v0 }
  0x97   :  { %v935_v47 = vand.u32 4294901760, %v2889_v53 }
  0x99   :  { %2114 = vmatpush3.bf16.msra.mxu0 %v2113_v21  ;;  %v936_v6 = vsub.f32 %v2889_v53, %v935_v47 }
  0x9a   :  { %2115 = vmatprep.subr.bf16.mxu0 %v2529_v0 }
  0x9d   :  { %2117 = vmatpush3.bf16.msra.mxu0 %v2116_v22  ;;  %v865_v22 = vand.u32 4294901760, %v2770_v30 }
  0x9e   :  { %2118 = vmatprep.subr.bf16.mxu0 %v2529_v0 }
  0xa0   :  { %1718 = vmatmul.mubr.f32.vlgmr.msra.gmra.mrb[0].mxu0 %v2647_v31 }
  0xa1   :  { %2120 = vmatpush3.bf16.msra.mxu0 %v2119_v14  ;;  %1752 = vmatprep.mubr.msk.f32.mxu0 %vm2530_vm0, %v2531_v1  ;;  %v872_v14 = vand.u32 4294901760, %v2772_v40 }
  0xa2   :  { %2121 = vmatprep.subr.bf16.mxu0 %v2529_v0 }
  0xa3   :  { %v873_v8 = vsub.f32 %v2772_v40, %v872_v14 }
  0xa5   :  { %2123 = vmatpush3.bf16.msra.mxu0 %v2122_v7  ;;  %v866_v7 = vsub.f32 %v2770_v30, %v865_v22  ;;  %v874_v10 = vand.u32 4294901760, %v873_v8  ;;  %v937_v8 = vand.u32 4294901760, %v936_v6 }
  0xa6   :  { %2124 = vmatprep.subr.bf16.mxu0 %v2529_v0 }
  0xa7   :  { %v867_v9 = vand.u32 4294901760, %v866_v7 }
  0xa9   :  { %2126 = vmatpush3.bf16.msra.mxu0 %v2125_v33  ;;  %v2919_v33 = vpack.c.bf16 %v874_v10, %v867_v9 }
  0xaa   :  { %2127 = vmatprep.subr.bf16.mxu0 %v2529_v0 }
  0xad   :  { %2129 = vmatpush3.bf16.msra.mxu0 %v2128_v16  ;;  %v880_v16 = vsub.f32 %v2774_v15, %v879_v11 }
  0xae   :  { %2130 = vmatprep.subr.bf16.mxu0 %v2529_v0 }
  0xb1   :  { %2132 = vmatpush3.bf16.msra.mxu0 %v2131_v43  ;;  %v887_v43 = vsub.f32 %v2776_v41, %v886_v24 }
  0xb2   :  { %2133 = vmatprep.subr.bf16.mxu0 %v2529_v0 }
  0xb5   :  { %2135 = vmatpush3.bf16.msra.mxu0 %v2134_v44  ;;  %v881_v44 = vand.u32 4294901760, %v880_v16 }
  0xb6   :  { %2136 = vmatprep.subr.bf16.mxu0 %v2529_v0 }
  0xb9   :  { %2138 = vmatpush3.bf16.msra.mxu0 %v2137_v50  ;;  %v888_v50 = vand.u32 4294901760, %v887_v43 }
  0xba   :  { %2139 = vmatprep.subr.bf16.mxu0 %v2529_v0 }
  0xbd   :  { %2141 = vmatpush3.bf16.msra.mxu0 %v2140_v51 }
  0xbe   :  { %2142 = vmatprep.subr.bf16.mxu0 %v2529_v0 }
  0xc0   :  { %1753 = vmatmul.mubr.f32.vlgmr.msra.gmra.mrb[0].mxu0 %v2664_v45 }
  0xc1   :  { %2144 = vmatpush3.bf16.msra.mxu0 %v2629_v12  ;;  %1787 = vmatprep.mubr.msk.f32.mxu0 %vm2530_vm0, %v2531_v1 }
  0xc2   :  { %2145 = vmatprep.subr.bf16.mxu0 %v2529_v0 }
  0xc5   :  { %2147 = vmatpush3.bf16.msra.mxu0 %v2632_v13 }
  0xc6   :  { %2148 = vmatprep.subr.bf16.mxu0 %v2529_v0 }
  0xc9   :  { %2150 = vmatpush3.bf16.msra.mxu0 %v2636_v18 }
  0xca   :  { %2151 = vmatprep.subr.bf16.mxu0 %v2529_v0 }
  0xcd   :  { %2153 = vmatpush3.bf16.msra.mxu0 %v2644_v26 }
  0xce   :  { %2154 = vmatprep.subr.bf16.mxu0 %v2529_v0 }
  0xd1   :  { %2156 = vmatpush3.bf16.msra.mxu0 %v2652_v38 }
  0xd2   :  { %2157 = vmatprep.subr.bf16.mxu0 %v2529_v0 }
  0xd5   :  { %2159 = vmatpush3.bf16.msra.mxu0 %v2676_v55 }
  0xd6   :  { %2160 = vmatprep.subr.bf16.mxu0 %v2529_v0 }
  0xd9   :  { %2162 = vmatpush3.bf16.msra.mxu0 %v2688_v62 }
  0xda   :  { %2163 = vmatprep.subr.bf16.mxu0 %v2529_v0 }
  0xdd   :  { %2165 = vmatpush3.bf16.msra.mxu0 %v2692_v2 }
  0xde   :  { %2166 = vmatprep.subr.bf16.mxu0 %v2529_v0 }
  0xe0   :  { %1788 = vmatmul.mubr.f32.vlgmr.msra.gmra.mrb[0].mxu0 %v195_v61  ;;  %v799_v61 = vand.u32 4294901760, %v764_v60 }
  0xe1   :  { %2168 = vmatpush3.bf16.msra.mxu0 %v2717_v28  ;;  %1822 = vmatprep.mubr.msk.f32.mxu0 %vm2530_vm0, %v2531_v1 }
  0xe2   :  { %2169 = vmatprep.subr.bf16.mxu0 %v2529_v0  ;;  %v2887_v49 = vsub.f32 %v764_v60, %v799_v61 }
  0xe5   :  { %2171 = vmatpush3.bf16.msra.mxu0 %v2719_v29  ;;  %v767_v29 = vld [vmem:[#allocation8 + $0x60] sm:$0xff] }
  0xe6   :  { %2172 = vmatprep.subr.bf16.mxu0 %v2529_v0 }
  0xe9   :  { %2174 = vmatpush3.bf16.msra.mxu0 %v2723_v32  ;;  %v768_v32 = vld [vmem:[#allocation8 + $0x68] sm:$0xff] }
  0xea   :  { %2175 = vmatprep.subr.bf16.mxu0 %v2529_v0 }
  0xed   :  { %2177 = vmatpush3.bf16.msra.mxu0 %v2725_v34  ;;  %v808_v34 = vand.u32 4294901760, %v767_v29 }
  0xee   :  { %2178 = vmatprep.subr.bf16.mxu0 %v2529_v0 }
  0xef   :  { %v2895_v20 = vsub.f32 %v767_v29, %v808_v34 }
  0xf1   :  { %2180 = vmatpush3.bf16.msra.mxu0 %v2727_v35  ;;  %v811_v35 = vand.u32 4294901760, %v768_v32  ;;  %v3119_v10 = vand.u32 4294901760, %v2895_v20 }
  0xf2   :  { %2181 = vmatprep.subr.bf16.mxu0 %v2529_v0 }
  0xf3   :  { %v2893_v19 = vpack.c.bf16 %v811_v35, %v808_v34  ;;  %v2897_v21 = vsub.f32 %v768_v32, %v811_v35 }
  0xf5   :  { %2183 = vmatpush3.bf16.msra.mxu0 %v2730_v36  ;;  %v3118_v16 = vand.u32 4294901760, %v2897_v21 }
  0xf6   :  { %2184 = vmatprep.subr.bf16.mxu0 %v2529_v0 }
  0xf9   :  { %2186 = vmatpush3.bf16.msra.mxu0 %v2732_v37 }
  0xfa   :  { %2187 = vmatprep.subr.bf16.mxu0 %v2529_v0 }
  0xfd   :  { %2189 = vmatpush3.bf16.msra.mxu0 %v2734_v39 }
  0xfe   :  { %2190 = vmatprep.subr.bf16.mxu0 %v2529_v0 }
 0x100   :  { %1823 = vmatmul.mubr.f32.vlgmr.msra.gmra.mrb[0].mxu0 %v2647_v31 }
 0x101   :  { %2192 = vmatpush3.bf16.msra.mxu0 %v2629_v12  ;;  %1857 = vmatprep.mubr.msk.f32.mxu0 %vm2530_vm0, %v2531_v1  ;;  %v759_v12 = vld [vmem:[#allocation8 + $0x20] sm:$0xff] }
 0x102   :  { %2193 = vmatprep.subr.bf16.mxu0 %v2529_v0 }
 0x105   :  { %2195 = vmatpush3.bf16.msra.mxu0 %v2632_v13  ;;  %v760_v13 = vld [vmem:[#allocation8 + $0x28] sm:$0xff] }
 0x106   :  { %2196 = vmatprep.subr.bf16.mxu0 %v2529_v0 }
 0x109   :  { %2198 = vmatpush3.bf16.msra.mxu0 %v2636_v18  ;;  %v784_v18 = vand.u32 4294901760, %v759_v12 }
 0x10a   :  { %2199 = vmatprep.subr.bf16.mxu0 %v2529_v0 }
 0x10b   :  { %v2877_v36 = vsub.f32 %v759_v12, %v784_v18 }
 0x10d   :  { %2201 = vmatpush3.bf16.msra.mxu0 %v2644_v26  ;;  %v787_v26 = vand.u32 4294901760, %v760_v13  ;;  %v893_v51 = vand.u32 4294901760, %v2877_v36 }
 0x10e   :  { %2202 = vmatprep.subr.bf16.mxu0 %v2529_v0 }
 0x10f   :  { %v2861_v45 = vpack.c.bf16 %v787_v26, %v784_v18  ;;  %v2879_v37 = vsub.f32 %v760_v13, %v787_v26  ;;  %v2929_v13 = vpack.c.bf16 %v888_v50, %v881_v44  ;;  %v894_v18 = vsub.f32 %v2877_v36, %v893_v51 }
 0x110   :  { %v950_v44 = vsub.f32 %v2895_v20, %v3119_v10  ;;  %v957_v50 = vsub.f32 %v2897_v21, %v3118_v16 }
 0x111   :  { %2204 = vmatpush3.bf16.msra.mxu0 %v2652_v38  ;;  %v761_v38 = vld [vmem:[#allocation8 + $0x30] sm:$0xff]  ;;  %2222 = vmatpush3.bf16.msra.mxu1 %v2861_v45  ;;  %v900_v12 = vand.u32 4294901760, %v2879_v37  ;;  %v2269_v6 = vpack.c.bf16 %v2879_v37, %v2877_v36  ;;  %v3120_v36 = vand.u32 4294901760, %v2895_v20 }
 0x112   :  { %2205 = vmatprep.subr.bf16.mxu0 %v2529_v0  ;;  %v790_v54 = vand.u32 4294901760, %v761_v38  ;;  %2223 = vmatprep.subr.bf16.mxu1 %v2529_v0 }
 0x113   :  { %v901_v26 = vsub.f32 %v2879_v37, %v900_v12  ;;  %v3121_v37 = vand.u32 4294901760, %v2897_v21 }
 0x114   :  { %v2881_v39 = vsub.f32 %v761_v38, %v790_v54  ;;  %v895_v38 = vand.u32 4294901760, %v894_v18  ;;  %v951_v18 = vand.u32 4294901760, %v950_v44  ;;  %v2281_v44 = vpack.c.bf16 %v2897_v21, %v2895_v20 }
 0x115   :  { %2207 = vmatpush3.bf16.msra.mxu0 %v2676_v55  ;;  %v793_v55 = vand.u32 4294901760, %v762_v52 }
 0x116   :  { %2208 = vmatprep.subr.bf16.mxu0 %v2529_v0 }
 0x117   :  { %v2865_v58 = vpack.c.bf16 %v793_v55, %v790_v54  ;;  %v2883_v46 = vsub.f32 %v762_v52, %v793_v55  ;;  %v902_v52 = vand.u32 4294901760, %v901_v26  ;;  %v907_v54 = vand.u32 4294901760, %v2881_v39 }
 0x118   :  { %v958_v26 = vand.u32 4294901760, %v957_v50  ;;  %v2284_v50 = vpack.c.bf16 %v2907_v5, %v2902_v23 }
 0x119   :  { %2210 = vmatpush3.bf16.msra.mxu0 %v2688_v62  ;;  %2225 = vmatpush3.bf16.msra.mxu1 %v2865_v58  ;;  %v914_v55 = vand.u32 4294901760, %v2883_v46  ;;  %v908_v60 = vsub.f32 %v2881_v39, %v907_v54 }
 0x11a   :  { %2211 = vmatprep.subr.bf16.mxu0 %v2529_v0  ;;  %2226 = vmatprep.subr.bf16.mxu1 %v2529_v0 }
 0x11d   :  { %2213 = vmatpush3.bf16.msra.mxu0 %v2692_v2  ;;  %v766_v2 = vld [vmem:[#allocation8 + $0x58] sm:$0xff] }
 0x11e   :  { %v805_v4 = vand.u32 4294901760, %v766_v2 }
 0x120   :  { %1858 = vmatmul.mubr.f32.vlgmr.msra.gmra.mrb[0].mxu0 %v2647_v31  ;;  %v796_v31 = vand.u32 4294901760, %v763_v59  ;;  %v2873_v28 = vpack.c.bf16 %v805_v4, %v802_v3  ;;  %v2891_v56 = vsub.f32 %v766_v2, %v805_v4  ;;  %v928_v3 = vand.u32 4294901760, %v2887_v49 }
 0x122   :  { %v2869_v62 = vpack.c.bf16 %v799_v61, %v796_v31  ;;  %v2885_v17 = vsub.f32 %v763_v59, %v796_v31  ;;  %v2245_v59 = vpack.c.bf16 %v902_v52, %v895_v38  ;;  %v915_v31 = vsub.f32 %v2883_v46, %v914_v55 }
 0x123   :  { %v909_v61 = vand.u32 4294901760, %v908_v60  ;;  %v929_v32 = vsub.f32 %v2887_v49, %v928_v3  ;;  %v942_v48 = vand.u32 4294901760, %v2891_v56  ;;  %v3117_v38 = vand.u32 4294901760, %v2902_v23 }
 0x124   :  { %2228 = vmatpush3.bf16.msra.mxu1 %v2869_v62  ;;  %v916_v63 = vand.u32 4294901760, %v915_v31  ;;  %v921_v2 = vand.u32 4294901760, %v2885_v17  ;;  %v3116_v52 = vand.u32 4294901760, %v2907_v5  ;;  %v2257_v60 = vpack.c.bf16 %v958_v26, %v951_v18  ;;  %v1444_v18 = vld [vmem:[#allocation7] ss:$0 sm:$0xff] }
 0x125   :  { %2229 = vmatprep.subr.bf16.mxu1 %v2529_v0  ;;  %v930_v35 = vand.u32 4294901760, %v929_v32  ;;  %v943_v7 = vsub.f32 %v2891_v56, %v942_v48  ;;  %v964_v31 = vsub.f32 %v2902_v23, %v3117_v38 }
 0x126   :  { %v2248_v4 = vpack.c.bf16 %v916_v63, %v909_v61  ;;  %v922_v29 = vsub.f32 %v2885_v17, %v921_v2  ;;  %v971_v61 = vsub.f32 %v2907_v5, %v3116_v52 }
 0x127   :  { %v944_v9 = vand.u32 4294901760, %v943_v7  ;;  %v965_v63 = vand.u32 4294901760, %v964_v31  ;;  %v2272_v7 = vpack.c.bf16 %v2883_v46, %v2881_v39  ;;  %v2329_v39 = vpack.c.bf16 %v3121_v37, %v3120_v36 }
 0x128   :  { %2231 = vmatpush3.bf16.msra.mxu1 %v2873_v28  ;;  %v923_v34 = vand.u32 4294901760, %v922_v29  ;;  %v972_v29 = vand.u32 4294901760, %v971_v61  ;;  %v3122_v46 = vand.u32 4294901760, %v2902_v23 }
 0x129   :  { %2232 = vmatprep.subr.bf16.mxu1 %v2529_v0  ;;  %v2254_v43 = vpack.c.bf16 %v944_v9, %v937_v8  ;;  %v2275_v8 = vpack.c.bf16 %v2887_v49, %v2885_v17  ;;  %v2278_v9 = vpack.c.bf16 %v2891_v56, %v2889_v53  ;;  %v3123_v17 = vand.u32 4294901760, %v2907_v5 }
 0x12a   :  { %v2251_v57 = vpack.c.bf16 %v930_v35, %v923_v34  ;;  %v2260_v32 = vpack.c.bf16 %v972_v29, %v965_v63  ;;  %v2263_v34 = vpack.c.bf16 %v2772_v40, %v2770_v30  ;;  %v2266_v35 = vpack.c.bf16 %v2776_v41, %v2774_v15 }
 0x12b   :  { %v2317_v30 = vpack.c.bf16 %v900_v12, %v893_v51  ;;  %v2320_v40 = vpack.c.bf16 %v914_v55, %v907_v54  ;;  %v2323_v15 = vpack.c.bf16 %v928_v3, %v921_v2  ;;  %v2326_v41 = vpack.c.bf16 %v942_v48, %v935_v47 }
 0x12c   :  { %2234 = vmatpush3.bf16.msra.mxu1 %v2893_v19  ;;  %v2332_v49 = vpack.c.bf16 %v3123_v17, %v3122_v46 }
 0x12d   :  { %2235 = vmatprep.subr.bf16.mxu1 %v2529_v0 }
 0x130   :  { %2237 = vmatpush3.bf16.msra.mxu1 %v2905_v27 }
 0x131   :  { %2238 = vmatprep.subr.bf16.mxu1 %v2529_v0 }
 0x1f3   :  { %v749_v26 = vpop.f32.mrb[0].mxu0 }
 0x1f4   :  { %v2358_v31 = vadd.f32 %v1444_v18, %v749_v26  ;;  %v1859_v61 = vpop.f32.mrb[1].mxu0 }
 0x1f6   :  { %2380 = vtanh.f32 %v2358_v31 }
 0x200   :  { %v2381_v63 = vpop.eup %2380 }
 0x201   :  { %v2993_v29 = vand.u32 4294901760, %v2381_v63 }
 0x203   :  { %v853_v52 = vsub.f32 %v2381_v63, %v2993_v29 }
 0x205   :  { %v854_v38 = vand.u32 4294901760, %v853_v52 }
 0x207   :  { %v855_v16 = vsub.f32 %v853_v52, %v854_v38 }
 0x209   :  { %v856_v10 = vand.u32 4294901760, %v855_v16 }
 0x20b   :  { %1893 = vmatmul.mubr.f32.vlgmr.msra.gmra.mrb[0].mxu1 %v856_v10 }
 0x20c   :  { %2240 = vmatpush3.bf16.msra.mxu1 %v2919_v33  ;;  %1927 = vmatprep.mubr.msk.f32.mxu1 %vm2530_vm0, %v2531_v1  ;;  %v2311_v33 = vpack.c.bf16 %v872_v14, %v865_v22 }
 0x20d   :  { %2241 = vmatprep.subr.bf16.mxu1 %v2529_v0 }
 0x210   :  { %2243 = vmatpush3.bf16.msra.mxu1 %v2929_v13  ;;  %v2314_v13 = vpack.c.bf16 %v886_v24, %v879_v11 }
 0x211   :  { %2244 = vmatprep.subr.bf16.mxu1 %v2529_v0 }
 0x214   :  { %2246 = vmatpush3.bf16.msra.mxu1 %v2245_v59 }
 0x215   :  { %2247 = vmatprep.subr.bf16.mxu1 %v2529_v0 }
 0x218   :  { %2249 = vmatpush3.bf16.msra.mxu1 %v2248_v4 }
 0x219   :  { %2250 = vmatprep.subr.bf16.mxu1 %v2529_v0 }
 0x21c   :  { %2252 = vmatpush3.bf16.msra.mxu1 %v2251_v57 }
 0x21d   :  { %2253 = vmatprep.subr.bf16.mxu1 %v2529_v0 }
 0x220   :  { %2255 = vmatpush3.bf16.msra.mxu1 %v2254_v43 }
 0x221   :  { %2256 = vmatprep.subr.bf16.mxu1 %v2529_v0 }
 0x224   :  { %2258 = vmatpush3.bf16.msra.mxu1 %v2257_v60 }
 0x225   :  { %2259 = vmatprep.subr.bf16.mxu1 %v2529_v0 }
 0x228   :  { %2261 = vmatpush3.bf16.msra.mxu1 %v2260_v32 }
 0x229   :  { %2262 = vmatprep.subr.bf16.mxu1 %v2529_v0 }
 0x22b   :  { %1928 = vmatmul.mubr.f32.vlgmr.msra.gmra.mrb[2].mxu1 %v2993_v29 }
 0x22c   :  { %2264 = vmatpush3.bf16.msra.mxu1 %v2263_v34  ;;  %1962 = vmatprep.mubr.msk.f32.mxu1 %vm2530_vm0, %v2531_v1 }
 0x22d   :  { %2265 = vmatprep.subr.bf16.mxu1 %v2529_v0 }
 0x230   :  { %2267 = vmatpush3.bf16.msra.mxu1 %v2266_v35 }
 0x231   :  { %2268 = vmatprep.subr.bf16.mxu1 %v2529_v0 }
 0x234   :  { %2270 = vmatpush3.bf16.msra.mxu1 %v2269_v6 }
 0x235   :  { %2271 = vmatprep.subr.bf16.mxu1 %v2529_v0 }
 0x238   :  { %2273 = vmatpush3.bf16.msra.mxu1 %v2272_v7 }
 0x239   :  { %2274 = vmatprep.subr.bf16.mxu1 %v2529_v0 }
 0x23c   :  { %2276 = vmatpush3.bf16.msra.mxu1 %v2275_v8 }
 0x23d   :  { %2277 = vmatprep.subr.bf16.mxu1 %v2529_v0 }
 0x240   :  { %2279 = vmatpush3.bf16.msra.mxu1 %v2278_v9 }
 0x241   :  { %2280 = vmatprep.subr.bf16.mxu1 %v2529_v0 }
 0x244   :  { %2282 = vmatpush3.bf16.msra.mxu1 %v2281_v44 }
 0x245   :  { %2283 = vmatprep.subr.bf16.mxu1 %v2529_v0 }
 0x248   :  { %2285 = vmatpush3.bf16.msra.mxu1 %v2284_v50 }
 0x249   :  { %2286 = vmatprep.subr.bf16.mxu1 %v2529_v0 }
 0x24b   :  { %1963 = vmatmul.mubr.f32.vlgmr.msra.gmra.mrb[4].mxu1 %v853_v52 }
 0x24c   :  { %2288 = vmatpush3.bf16.msra.mxu1 %v2768_v25  ;;  %1997 = vmatprep.mubr.msk.f32.mxu1 %vm2530_vm0, %v2531_v1 }
 0x24d   :  { %2289 = vmatprep.subr.bf16.mxu1 %v2529_v0 }
 0x250   :  { %2291 = vmatpush3.bf16.msra.mxu1 %v2781_v42 }
 0x251   :  { %2292 = vmatprep.subr.bf16.mxu1 %v2529_v0 }
 0x254   :  { %2294 = vmatpush3.bf16.msra.mxu1 %v2861_v45 }
 0x255   :  { %2295 = vmatprep.subr.bf16.mxu1 %v2529_v0 }
 0x258   :  { %2297 = vmatpush3.bf16.msra.mxu1 %v2865_v58 }
 0x259   :  { %2298 = vmatprep.subr.bf16.mxu1 %v2529_v0 }
 0x25c   :  { %2300 = vmatpush3.bf16.msra.mxu1 %v2869_v62 }
 0x25d   :  { %2301 = vmatprep.subr.bf16.mxu1 %v2529_v0 }
 0x260   :  { %2303 = vmatpush3.bf16.msra.mxu1 %v2873_v28 }
 0x261   :  { %2304 = vmatprep.subr.bf16.mxu1 %v2529_v0 }
 0x264   :  { %2306 = vmatpush3.bf16.msra.mxu1 %v2893_v19 }
 0x265   :  { %2307 = vmatprep.subr.bf16.mxu1 %v2529_v0 }
 0x268   :  { %2309 = vmatpush3.bf16.msra.mxu1 %v2905_v27 }
 0x269   :  { %2310 = vmatprep.subr.bf16.mxu1 %v2529_v0 }
 0x26b   :  { %1998 = vmatmul.mubr.f32.vlgmr.msra.gmra.mrb[6].mxu1 %v854_v38 }
 0x26c   :  { %2312 = vmatpush3.bf16.msra.mxu1 %v2311_v33  ;;  %2032 = vmatprep.mubr.msk.f32.mxu1 %vm2530_vm0, %v2531_v1 }
 0x26d   :  { %2313 = vmatprep.subr.bf16.mxu1 %v2529_v0 }
 0x270   :  { %2315 = vmatpush3.bf16.msra.mxu1 %v2314_v13 }
 0x271   :  { %2316 = vmatprep.subr.bf16.mxu1 %v2529_v0 }
 0x274   :  { %2318 = vmatpush3.bf16.msra.mxu1 %v2317_v30 }
 0x275   :  { %2319 = vmatprep.subr.bf16.mxu1 %v2529_v0 }
 0x278   :  { %2321 = vmatpush3.bf16.msra.mxu1 %v2320_v40 }
 0x279   :  { %2322 = vmatprep.subr.bf16.mxu1 %v2529_v0 }
 0x27c   :  { %2324 = vmatpush3.bf16.msra.mxu1 %v2323_v15 }
 0x27d   :  { %2325 = vmatprep.subr.bf16.mxu1 %v2529_v0 }
 0x280   :  { %2327 = vmatpush3.bf16.msra.mxu1 %v2326_v41 }
 0x281   :  { %2328 = vmatprep.subr.bf16.mxu1 %v2529_v0 }
 0x284   :  { %2330 = vmatpush3.bf16.msra.mxu1 %v2329_v39 }
 0x285   :  { %2331 = vmatprep.subr.bf16.mxu1 %v2529_v0 }
 0x288   :  { %2333 = vmatpush3.bf16.msra.mxu1 %v2332_v49 }
 0x289   :  { %2334 = vmatprep.subr.bf16.mxu1 %v2529_v0 }
 0x28b   :  { %2033 = vmatmul.mubr.f32.vlgmr.msra.gmra.mrb[8].mxu1 %v2993_v29 }
 0x28c   :  { %2336 = vmatpush3.bf16.msra.mxu1 %v2768_v25  ;;  %2067 = vmatprep.mubr.msk.f32.mxu1 %vm2530_vm0, %v2531_v1 }
 0x28d   :  { %2337 = vmatprep.subr.bf16.mxu1 %v2529_v0 }
 0x290   :  { %2339 = vmatpush3.bf16.msra.mxu1 %v2781_v42 }
 0x291   :  { %2340 = vmatprep.subr.bf16.mxu1 %v2529_v0 }
 0x294   :  { %2342 = vmatpush3.bf16.msra.mxu1 %v2861_v45 }
 0x295   :  { %2343 = vmatprep.subr.bf16.mxu1 %v2529_v0 }
 0x298   :  { %2345 = vmatpush3.bf16.msra.mxu1 %v2865_v58 }
 0x299   :  { %2346 = vmatprep.subr.bf16.mxu1 %v2529_v0 }
 0x29c   :  { %2348 = vmatpush3.bf16.msra.mxu1 %v2869_v62 }
 0x29d   :  { %2349 = vmatprep.subr.bf16.mxu1 %v2529_v0 }
 0x2a0   :  { %2351 = vmatpush3.bf16.msra.mxu1 %v2873_v28 }
 0x2a1   :  { %2352 = vmatprep.subr.bf16.mxu1 %v2529_v0 }
 0x2a4   :  { %2354 = vmatpush3.bf16.msra.mxu1 %v2893_v19 }
 0x2a5   :  { %2355 = vmatprep.subr.bf16.mxu1 %v2529_v0 }
 0x2a8   :  { %2357 = vmatpush3.bf16.msra.mxu1 %v2905_v27  ;;  %v1445_v27 = vld [vmem:[#allocation10] ss:$0 sm:$0xff] }
 0x2ab   :  { %2068 = vmatmul.mubr.f32.vlgmr.msra.gmra.mrb[10].mxu1 %v2993_v29 }
 0x2de   :  { %v858_v1 = vpop.f32.mrb[0].mxu1 }
 0x2df   :  { %v1894_v25 = vpop.f32.mrb[1].mxu1 }
 0x2fe   :  { %v1009_v42 = vpop.f32.mrb[2].mxu1 }
 0x2ff   :  { %v1010_v45 = vadd.f32 %v1009_v42, %v858_v1  ;;  %v1929_v58 = vpop.f32.mrb[3].mxu1 }
 0x31e   :  { %v1113_v62 = vpop.f32.mrb[4].mxu1 }
 0x31f   :  { %v1114_v53 = vadd.f32 %v1113_v62, %v1010_v45  ;;  %v1964_v56 = vpop.f32.mrb[5].mxu1 }
 0x33e   :  { %v1202_v20 = vpop.f32.mrb[6].mxu1 }
 0x33f   :  { %v1203_v28 = vadd.f32 %v1202_v20, %v1114_v53  ;;  %v1999_v21 = vpop.f32.mrb[7].mxu1 }
 0x35e   :  { %v1321_v22 = vpop.f32.mrb[8].mxu1 }
 0x35f   :  { %v1322_v14 = vadd.f32 %v1321_v22, %v1203_v28  ;;  %v2034_v19 = vpop.f32.mrb[9].mxu1 }
 0x37e   :  { %v1408_v23 = vpop.f32.mrb[10].mxu1 }
 0x37f   :  { %v1409_v0 = vadd.f32 %v1408_v23, %v1322_v14  ;;  %v2069_v5 = vpop.f32.mrb[11].mxu1 }
 0x381   :  { %v1425_v11 = vadd.f32 %v1445_v27, %v1409_v0 }
 0x383   :  { %1426 = vst [vmem:[#allocation11] sm:$0xff] %v1425_v11 }
 0x384   :  { %2503 = shalt.err (!%p2500_p2)
}
 0x385   :  { %s2504_s30 = scalar_lea.hbm %s3115_s5, 128 }
 0x386   :  { %p2505_p3 = scmp.ne.s32.totalorder %s3115_s5, %s2504_s30  ;;  %p2508_p4 = scmp.lt.u32.totalorder %s2504_s30, %s3115_s5 }
 0x388   :  { %p2510_p5 = pnand %p2508_p4, %p2505_p3 }
 0x38a   :  { %2513 = shalt.err (!%p2510_p5)
}
 0x38b   :  { %1436 = dma.vmem_to_hbm [thread:$0]  %s1434_s27, 128, %s3115_s5, [#allocation4]  }
 0x38c   :  { %2520 = dma.done.wait [#allocation4], 128  }
 0x38d   :  { %2521 = vsyncadd [#allocation4], 4294967168 }
 0x38e   :  { %1440 = vsyncpa [#allocation3], 1 }
 0x38f   :  { %1441 = vsyncpa [#allocation6], 1 }
 0x390   :  { %1442 = vsyncpa [#allocation9], 1 }
 0x391   :  { %1443 = vsyncpa [#allocation4], 1 }

</bundles_post_ra>
